<compile_context>
chip_gen: v7x
topology: tpu7x:2x2x1
jax: 0.10.0
libtpu: 0.0.40
codegen_flags: <defaults>
</compile_context>

<pallas_src>
import jax
import jax.numpy as jnp
from jax.experimental import pallas as pl
from jax.experimental.pallas import tpu as pltpu


def _ffn_swiglu_kernel(x_ref, w1_ref, w3_ref, w2_ref, o_ref, acc_ref):
    """One (token-tile, hidden-chunk) step of the SwiGLU feed-forward."""
    h = pl.program_id(1)

    @pl.when(h == 0)
    def _():
        acc_ref[...] = jnp.zeros_like(acc_ref)

    x = x_ref[...]                                    # (tn, dim), compute dtype
    h1 = jnp.dot(x, w1_ref[...], preferred_element_type=jnp.float32)   # (tn, th) f32
    h3 = jnp.dot(x, w3_ref[...], preferred_element_type=jnp.float32)   # (tn, th) f32

    # silu(h1) = h1 * sigmoid(h1); exp -> EUP slot, reciprocal -> EUP (approx).
    gate = h1 * pl.reciprocal(1.0 + jnp.exp(-h1), approx=True)
    inter = (gate * h3).astype(x_ref.dtype)           # feed second MXU pass in compute dtype

    acc_ref[...] += jnp.dot(inter, w2_ref[...], preferred_element_type=jnp.float32)

    @pl.when(h == pl.num_programs(1) - 1)
    def _():
        o_ref[...] = acc_ref[...].astype(o_ref.dtype)


def _choose_tiles(n, dim, hidden, itemsize, out_itemsize, tile_n, tile_h,
                  vmem_budget):
    """Pick (tile_n, tile_h, weight_buffer_count) within the VMEM budget."""
    sub = 8 if itemsize >= 4 else max(8, 32 // itemsize)   # sublane packing

    if tile_h is None:
        resident_w = 2 * 3 * dim * hidden * itemsize        # double-buffer accounting
        if resident_w <= vmem_budget // 2:
            tile_h = hidden                                  # fully-resident fast path
        elif hidden % 128 == 0:
            tile_h = 128
            for cand in (1024, 512, 256, 128):
                if cand <= hidden and hidden % cand == 0:
                    if (2 * 3 * dim * cand * itemsize <= vmem_budget // 3
                            or cand == 128):
                        tile_h = cand
                        break
        else:
            tile_h = hidden                                  # cannot chunk cleanly
    assert hidden % tile_h == 0, "tile_h must divide hidden (reduction axis)"

    n_h_chunks = hidden // tile_h

    # Per token row: x + out double-buffered, f32 accumulator, f32 intermediates.
    per_row = (2 * dim * itemsize + 2 * dim * out_itemsize
               + dim * 4 + 3 * tile_h * 4)
    w_bytes = 2 * 3 * dim * tile_h * itemsize                # double-buffered chunk

    if tile_n is None:
        avail = max(vmem_budget - w_bytes, 64 * per_row)
        tile_n = int(min(1024, avail // per_row))
        tile_n = max(sub, (tile_n // sub) * sub)
        # Keep >= 2 token tiles when the batch allows it (dual-TC / megacore).
        if n >= 2 * sub:
            half = -(-n // 2)
            half = ((half + sub - 1) // sub) * sub
            tile_n = min(tile_n, half)
    if n <= tile_n:
        tile_n = n                                           # full-extent block (legal)

    # Depth-3 buffering on weight chunks only when hidden is chunked and the
    # extra buffer still fits the budget.
    weight_buffers = 2
    if n_h_chunks > 1:
        if 3 * 3 * dim * tile_h * itemsize + tile_n * per_row <= vmem_budget:
            weight_buffers = 3

    return tile_n, tile_h, weight_buffers


def feed_forward_swiglu(x, w1, w2, w3, *, tile_n=None, tile_h=None,
                        compute_dtype=None):
    """x: (..., dim).  w1/w3: (hidden, dim), w2: (dim, hidden) — PyTorch Linear layout.

    compute_dtype: optional dtype for the MXU operands (pass jnp.bfloat16 in
    production for full-rate matmuls; accumulation is always f32).
    """
    orig_shape = x.shape
    dim = x.shape[-1]
    hidden = w1.shape[0]
    assert w1.shape == (hidden, dim)
    assert w3.shape == (hidden, dim)
    assert w2.shape == (dim, hidden)

    out_dtype = x.dtype
    cdt = jnp.dtype(compute_dtype) if compute_dtype is not None else jnp.dtype(x.dtype)

    x2d = x.reshape(-1, dim).astype(cdt)
    n = x2d.shape[0]

    # Pre-transpose (and optionally downcast) the weights once in the wrapper
    # (plain XLA) so the kernel never transposes inside the grid loop.
    w1_t = jnp.transpose(w1).astype(cdt)    # (dim, hidden)
    w3_t = jnp.transpose(w3).astype(cdt)    # (dim, hidden)
    w2_t = jnp.transpose(w2).astype(cdt)    # (hidden, dim)

    itemsize = cdt.itemsize
    out_itemsize = jnp.dtype(out_dtype).itemsize

    # Generation-aware VMEM budget (~75% of physical capacity).
    try:
        phys_vmem = int(pltpu.get_tpu_info().vmem_capacity_bytes)
    except Exception:
        phys_vmem = 64 * 1024 * 1024        # conservative fallback (v7x per-TC VMEM)
    vmem_budget = (phys_vmem * 3) // 4

    tn, th, w_bufs = _choose_tiles(n, dim, hidden, itemsize, out_itemsize,
                                   tile_n, tile_h, vmem_budget)

    grid = (pl.cdiv(n, tn), hidden // th)   # reduction (hidden) axis last

    # Estimated VMEM usage; vmem_limit is never below it and never above phys.
    est = (w_bufs * 3 * dim * th * itemsize   # buffered weight chunks
           + 2 * tn * dim * itemsize          # x tile, double-buffered
           + 2 * tn * dim * out_itemsize      # out tile, double-buffered
           + tn * dim * 4                     # f32 accumulator scratch
           + 3 * tn * th * 4)                 # f32 intermediates h1/h3/inter
    vmem_limit = int(min(phys_vmem, max(est + est // 4, 32 * 1024 * 1024)))
    vmem_limit = max(vmem_limit, min(est, phys_vmem))

    wkw = dict(pipeline_mode=pl.Buffered(3)) if w_bufs == 3 else {}
    in_specs = [
        pl.BlockSpec((tn, dim), lambda i, h: (i, 0)),          # x tile, resident over h
        pl.BlockSpec((dim, th), lambda i, h: (0, h), **wkw),   # w1^T chunk
        pl.BlockSpec((dim, th), lambda i, h: (0, h), **wkw),   # w3^T chunk
        pl.BlockSpec((th, dim), lambda i, h: (h, 0), **wkw),   # w2^T chunk
    ]

    out2d = pl.pallas_call(
        _ffn_swiglu_kernel,
        out_shape=jax.ShapeDtypeStruct((n, dim), out_dtype),
        grid=grid,
        in_specs=in_specs,
        out_specs=pl.BlockSpec((tn, dim), lambda i, h: (i, 0)),
        scratch_shapes=[pltpu.VMEM((tn, dim), jnp.float32)],
        compiler_params=pltpu.CompilerParams(
            dimension_semantics=("parallel", "arbitrary"),
            vmem_limit_bytes=vmem_limit,
        ),
    )(x2d, w1_t, w3_t, w2_t)

    return out2d.reshape(orig_shape)


if __name__ == "__main__":
    # Small config consistent with FeedForwardSwiGLU.__init__:
    dim = 64
    hidden_dim_arg = 128
    multiple_of = 32
    hidden = int(2 * hidden_dim_arg / 3)                                  # 85
    hidden = multiple_of * ((hidden + multiple_of - 1) // multiple_of)    # -> 96
    batch, seq = 2, 8

    key = jax.random.PRNGKey(0)
    kx, k1, k2, k3 = jax.random.split(key, 4)
    x = jax.random.normal(kx, (batch, seq, dim), dtype=jnp.float32)
    # PyTorch nn.Linear weight layout: (out_features, in_features)
    w1 = jax.random.normal(k1, (hidden, dim), dtype=jnp.float32) / jnp.sqrt(dim)
    w3 = jax.random.normal(k3, (hidden, dim), dtype=jnp.float32) / jnp.sqrt(dim)
    w2 = jax.random.normal(k2, (dim, hidden), dtype=jnp.float32) / jnp.sqrt(hidden)

    # tile_n=8 -> grid (2, 1): exercises the multi-step token grid at toy size;
    # weights take the fully-VMEM-resident fast path.
    out = feed_forward_swiglu(x, w1, w2, w3, tile_n=8)
    out = jax.block_until_ready(out)

    # pure-JAX reference
    h1 = x @ w1.T
    h3 = x @ w3.T
    ref = (jax.nn.silu(h1) * h3) @ w2.T

    assert out.shape == x.shape
    err = float(jnp.max(jnp.abs(out - ref)))
    # Tolerance covers the approximate EUP reciprocal used inside silu (and,
    # when compute_dtype=bf16 is used, the in-kernel downcast of the gated
    # intermediate before the w2 matmul).
    assert jnp.allclose(out, ref, atol=5e-3, rtol=5e-3), err

    print("KERNEL_OK")
</pallas_src>

<mosaic_0001>
module attributes {stable_mosaic.version = 11 : i64} {
  func.func @_ffn_swiglu_kernel(%arg0: i32, %arg1: i32, %arg2: memref<8x64xf32, #tpu.memory_space<vmem>>, %arg3: memref<64x96xf32, #tpu.memory_space<vmem>>, %arg4: memref<64x96xf32, #tpu.memory_space<vmem>>, %arg5: memref<96x64xf32, #tpu.memory_space<vmem>>, %arg6: memref<8x64xf32, #tpu.memory_space<vmem>>, %arg7: memref<8x64xf32, #tpu.memory_space<vmem>>) attributes {dimension_semantics = [#tpu.dimension_semantics<parallel>, #tpu.dimension_semantics<arbitrary>], iteration_bounds = array<i64: 2, 1>, scalar_prefetch = 0 : i64, scratch_operands = 1 : i64, tpu.core_type = #tpu.core_type<tc>, window_params = [{transform_indices = @transform_0, window_bounds = array<i64: 8, 64>}, {transform_indices = @transform_1, window_bounds = array<i64: 64, 96>}, {transform_indices = @transform_2, window_bounds = array<i64: 64, 96>}, {transform_indices = @transform_3, window_bounds = array<i64: 96, 64>}, {transform_indices = @transform_4, window_bounds = array<i64: 8, 64>}]} {
    %c0_i32 = arith.constant 0 : i32
    %0 = arith.cmpi eq, %arg1, %c0_i32 : i32
    %1 = arith.extui %0 : i1 to i32
    %c0_i32_0 = arith.constant 0 : i32
    %2 = arith.cmpi ne, %1, %c0_i32_0 : i32
    scf.if %2 {
      %cst_18 = arith.constant 0.000000e+00 : f32
      %24 = vector.broadcast %cst_18 : f32 to vector<8x64xf32>
      %c0_19 = arith.constant 0 : index
      %c0_20 = arith.constant 0 : index
      %25 = vector.load %arg7[%c0_19, %c0_20] : memref<8x64xf32, #tpu.memory_space<vmem>>, vector<8x64xf32>
      tpu.vector_store %arg7[%c0_19, %c0_20], %24 {strides = array<i32>} : memref<8x64xf32, #tpu.memory_space<vmem>>, vector<8x64xf32>,
    } else {
    }
    %c0 = arith.constant 0 : index
    %c0_1 = arith.constant 0 : index
    %3 = vector.load %arg2[%c0, %c0_1] : memref<8x64xf32, #tpu.memory_space<vmem>>, vector<8x64xf32>
    %c0_2 = arith.constant 0 : index
    %c0_3 = arith.constant 0 : index
    %4 = vector.load %arg3[%c0_2, %c0_3] : memref<64x96xf32, #tpu.memory_space<vmem>>, vector<64x96xf32>
    %cst = arith.constant dense<0.000000e+00> : vector<8x96xf32>
    %5 = tpu.matmul %3, %4, %cst {dimension_numbers = #tpu.dot_dimension_numbers<[1], [0], [0], [1], [0, 0, 1, 1], [], []>} : vector<8x64xf32>, vector<64x96xf32>, vector<8x96xf32> -> vector<8x96xf32>
    %c0_4 = arith.constant 0 : index
    %c0_5 = arith.constant 0 : index
    %6 = vector.load %arg4[%c0_4, %c0_5] : memref<64x96xf32, #tpu.memory_space<vmem>>, vector<64x96xf32>
    %cst_6 = arith.constant dense<0.000000e+00> : vector<8x96xf32>
    %7 = tpu.matmul %3, %6, %cst_6 {dimension_numbers = #tpu.dot_dimension_numbers<[1], [0], [0], [1], [0, 0, 1, 1], [], []>} : vector<8x64xf32>, vector<64x96xf32>, vector<8x96xf32> -> vector<8x96xf32>
    %cst_7 = arith.constant 0.000000e+00 : f32
    %8 = vector.broadcast %cst_7 : f32 to vector<8x96xf32>
    %9 = arith.subf %8, %5 : vector<8x96xf32>
    %10 = math.exp %9 : vector<8x96xf32>
    %cst_8 = arith.constant 1.000000e+00 : f32
    %11 = vector.broadcast %cst_8 : f32 to vector<8x96xf32>
    %12 = arith.addf %11, %10 : vector<8x96xf32>
    %13 = tpu.reciprocal %12 {approx = true} : vector<8x96xf32> -> vector<8x96xf32>
    %14 = arith.mulf %5, %13 : vector<8x96xf32>
    %15 = arith.mulf %14, %7 : vector<8x96xf32>
    %c0_9 = arith.constant 0 : index
    %c0_10 = arith.constant 0 : index
    %16 = vector.load %arg7[%c0_9, %c0_10] : memref<8x64xf32, #tpu.memory_space<vmem>>, vector<8x64xf32>
    %c0_11 = arith.constant 0 : index
    %c0_12 = arith.constant 0 : index
    %17 = vector.load %arg5[%c0_11, %c0_12] : memref<96x64xf32, #tpu.memory_space<vmem>>, vector<96x64xf32>
    %cst_13 = arith.constant dense<0.000000e+00> : vector<8x64xf32>
    %18 = tpu.matmul %15, %17, %cst_13 {dimension_numbers = #tpu.dot_dimension_numbers<[1], [0], [0], [1], [0, 0, 1, 1], [], []>} : vector<8x96xf32>, vector<96x64xf32>, vector<8x64xf32> -> vector<8x64xf32>
    %19 = arith.addf %16, %18 : vector<8x64xf32>
    %c0_14 = arith.constant 0 : index
    %c0_15 = arith.constant 0 : index
    %20 = vector.load %arg7[%c0_14, %c0_15] : memref<8x64xf32, #tpu.memory_space<vmem>>, vector<8x64xf32>
    tpu.vector_store %arg7[%c0_14, %c0_15], %19 {strides = array<i32>} : memref<8x64xf32, #tpu.memory_space<vmem>>, vector<8x64xf32>,
    %c0_i32_16 = arith.constant 0 : i32
    %21 = arith.cmpi eq, %arg1, %c0_i32_16 : i32
    %22 = arith.extui %21 : i1 to i32
    %c0_i32_17 = arith.constant 0 : i32
    %23 = arith.cmpi ne, %22, %c0_i32_17 : i32
    scf.if %23 {
      %c0_18 = arith.constant 0 : index
      %c0_19 = arith.constant 0 : index
      %24 = vector.load %arg7[%c0_18, %c0_19] : memref<8x64xf32, #tpu.memory_space<vmem>>, vector<8x64xf32>
      %c0_20 = arith.constant 0 : index
      %c0_21 = arith.constant 0 : index
      %25 = vector.load %arg6[%c0_20, %c0_21] : memref<8x64xf32, #tpu.memory_space<vmem>>, vector<8x64xf32>
      tpu.vector_store %arg6[%c0_20, %c0_21], %24 {strides = array<i32>} : memref<8x64xf32, #tpu.memory_space<vmem>>, vector<8x64xf32>,
    } else {
    }
    return
  }
  func.func @transform_0(%arg0: i32, %arg1: i32) -> (i32, i32) {
    %c0_i32 = arith.constant 0 : i32
    %c0_i32_0 = arith.constant 0 : i32
    return %arg0, %c0_i32 : i32, i32
  }
  func.func @transform_1(%arg0: i32, %arg1: i32) -> (i32, i32) {
    %c0_i32 = arith.constant 0 : i32
    %c0_i32_0 = arith.constant 0 : i32
    return %c0_i32, %arg1 : i32, i32
  }
  func.func @transform_2(%arg0: i32, %arg1: i32) -> (i32, i32) {
    %c0_i32 = arith.constant 0 : i32
    %c0_i32_0 = arith.constant 0 : i32
    return %c0_i32, %arg1 : i32, i32
  }
  func.func @transform_3(%arg0: i32, %arg1: i32) -> (i32, i32) {
    %c0_i32 = arith.constant 0 : i32
    %c0_i32_0 = arith.constant 0 : i32
    return %arg1, %c0_i32 : i32, i32
  }
  func.func @transform_4(%arg0: i32, %arg1: i32) -> (i32, i32) {
    %c0_i32 = arith.constant 0 : i32
    %c0_i32_0 = arith.constant 0 : i32
    return %arg0, %c0_i32 : i32, i32
  }
}

</mosaic_0001>

<bundles_post_ra>
// kernel: tpu_custom_call.1
= control target key start
LH: loop header
LB: loop body
LE: loop exit
PB: predicated region body
PF: predicated region fallthrough
CT: control target
= control target key end

     0   :  { %9 = vsyncpa [#allocation4], 0  ;;  %s1199_s0 = inlined_call_operand.vmem [shape: f32[16,64], index: 0, kind: input, shape index: {}]   ;;  %s1200_s1 = inlined_call_operand.vmem [shape: f32[64,96], index: 1, kind: input, shape index: {}]   ;;  %s1201_s2 = inlined_call_operand.vmem [shape: f32[64,96], index: 2, kind: input, shape index: {}]   ;;  %s1202_s3 = inlined_call_operand.vmem [shape: f32[96,64], index: 3, kind: input, shape index: {}]   ;;  %s1203_s4 = inlined_call_operand.hbm [shape: f32[16,64], index: 4, kind: output, shape index: {}]  }
   0x1   :  { %11 = vsyncpa [#allocation4 + $0x1], 0  ;;  %s981_s15 = smov 0   ;;  %s983_s16 = smov 0  }
   0x2   :  { %s985_s17 = smov 0   ;;  %s987_s18 = smov 0  }
   0x3   :  { %s989_s19 = smov 0   ;;  %s991_s20 = smov 0  }
   0x4 LB: > { %s655_s21 = sadd.s32 4294967295, %s950_s20   ;;  %s656_s22 = sadd.s32 4294967294, %s950_s20   ;;  %s950_s20 = sphi %s991_s20, %s17_s20   ;;  %s946_s19 = sphi %s989_s19, %s1210_s19   ;;  %s942_s18 = sphi %s987_s18, %s1209_s18   ;;  %s938_s17 = sphi %s985_s17, %s1208_s17   ;;  %s934_s16 = sphi %s983_s16, %s1207_s16   ;;  %s930_s15 = sphi %s981_s15, %s1206_s15  }
   0x5   : > { %s29_s23 = sadd.s32 1, %s946_s19  ;;  %s140_s24 = sadd.s32 1, %s938_s17 }
   0x6   : > { %p31_p0 = scmp.ge.s32.totalorder %s29_s23, 2  ;;  %p150_p1 = scmp.ne.s32.totalorder %s938_s17, %s934_s16 }
   0x7   : > { %p151_p2 = scmp.eq.s32.totalorder %s655_s21, 1  ;;  %p156_p3 = scmp.ne.s32.totalorder %s934_s16, %s930_s15 }
   0x8   : > { %s1212_s23 = smov (%p31_p0, %s29_s23), 0  ;;  %p157_p5 = scmp.eq.s32.totalorder %s656_s22, 1 }
   0x9   : > { %p1021_p4 = por %p151_p2, %p150_p1  ;;  %s137_s26 = ssub.s32 %s946_s19, %s1212_s23 }
   0xa   : > { %p662_p6 = scmp.ge.s32.totalorder %s950_s20, 1  ;;  %p138_p7 = scmp.eq.s32.totalorder %s137_s26, 0 }
   0xb   : > { %p1028_p8 = por %p157_p5, %p156_p3  ;;  %p205_p9 = scmp.lt.s32.totalorder %s950_s20, 3 }
   0xc   : > { %s1034_s28 = scalar_select %p138_p7, %s938_s17, %s140_s24  }
   0xd   : > { %p206_p10 = pnand %p662_p6, %p205_p9 }
   0xe   : > { %v268_v0 = vld [vmem:[%s1200_s1] sm:$0xff] (!%p206_p10)  ;;  %v269_v1 = vld [vmem:[%s1200_s1 + $0x8] sm:$0xff] (!%p206_p10)  ;;  %v270_v2 = vld [vmem:[%s1200_s1 + $0x10] sm:$0xff] (!%p206_p10)  ;;  %v952_v3 = vmov (!%p206_p10), 0.0|0.0   ;;  %vm953_vm0 = vmmov (!%p206_p10), 0   ;;  %v954_v6 = vmov (!%p206_p10), 0.0  }
   0xf   : > { %209 = sbr.rel (%p206_p10) target bundleno = 512 (0x200), region = 36  ;;  %768 = vmatprep.subr.bf16.mxu1 (!%p206_p10), %v952_v3  ;;  %v769_v4 = vpack.c.bf16 (!%p206_p10), %v269_v1, %v268_v0  ;;  %v271_v5 = vld [vmem:[%s1200_s1 + $0x18] sm:$0xff] (!%p206_p10)  ;;  %719 = vmatprep.mubr.msk.f32.mxu1 (!%p206_p10), %vm953_vm0, %v954_v6  ;;  %p243_p11 = scmp.lt.s32.totalorder (!%p206_p10), %s942_s18, 1  ;;  %vm265_vm1 = vcmask (!%p206_p10), 523264   ;;  %v272_v8 = vld [vmem:[%s1200_s1 + $0x20] sm:$0xff] (!%p206_p10)  ;;  %v273_v9 = vld [vmem:[%s1200_s1 + $0x28] sm:$0xff] (!%p206_p10) }
  0x10   : > { %266 = vst.msk [vmem:[#allocation2] sm:$0xff] (!%p206_p10), %vm265_vm1, %v954_v6  ;;  %792 = vmatprep.subr.bf16.mxu0 (!%p206_p10), %v952_v3  ;;  %765 = vmatprep.mubr.msk.f32.mxu0 (!%p206_p10), %vm953_vm0, %v954_v6  ;;  %v772_v7 = vpack.c.bf16 (!%p206_p10), %v271_v5, %v270_v2  ;;  %v775_v10 = vpack.c.bf16 (!%p206_p10), %v273_v9, %v272_v8  ;;  %v274_v11 = vld [vmem:[%s1200_s1 + $0x30] sm:$0xff] (!%p206_p10)  ;;  %v275_v12 = vld [vmem:[%s1200_s1 + $0x38] sm:$0xff] (!%p206_p10)  ;;  %v350_v14 = vld [vmem:[%s1201_s2] sm:$0xff] (!%p206_p10)  ;;  %vm448_vm2 = vcmask (!%p206_p10), 785408   ;;  %s240_s22 = sand.u32 (!%p206_p10), 1, %s934_s16  }
  0x11   : > { %770 = vmatpush3.bf16.msra.mxu1 (!%p206_p10), %v769_v4  ;;  %v778_v13 = vpack.c.bf16 (!%p206_p10), %v275_v12, %v274_v11  ;;  %v351_v15 = vld [vmem:[%s1201_s2 + $0x8] sm:$0xff] (!%p206_p10)  ;;  %v352_v18 = vld [vmem:[%s1201_s2 + $0x10] sm:$0xff] (!%p206_p10)  ;;  %v353_v19 = vld [vmem:[%s1201_s2 + $0x18] sm:$0xff] (!%p206_p10)  ;;  %s663_s24 = sshll.u32 (!%p206_p10), %s240_s22, 3  ;;  %s669_s26 = sshll.u32 (!%p206_p10), %s942_s18, 7 }
  0x12   : > { %771 = vmatprep.subr.bf16.mxu1 (!%p206_p10), %v952_v3  ;;  %v781_v17 = vpack.c.bf16 (!%p206_p10), %v351_v15, %v350_v14  ;;  %v784_v20 = vpack.c.bf16 (!%p206_p10), %v353_v19, %v352_v18  ;;  %v354_v21 = vld [vmem:[%s1201_s2 + $0x20] sm:$0xff] (!%p206_p10)  ;;  %v355_v22 = vld [vmem:[%s1201_s2 + $0x28] sm:$0xff] (!%p206_p10)  ;;  %v356_v24 = vld [vmem:[%s1201_s2 + $0x30] sm:$0xff] (!%p206_p10)  ;;  %s242_s29 = scalar_lea.vmem (!%p206_p10), [#allocation3], %s663_s24  ;;  %s530_s8 = scalar_lea.sflag (!%p206_p10), [#allocation4], %s240_s22 }
  0x13   : > { %v787_v23 = vpack.c.bf16 (!%p206_p10), %v355_v22, %v354_v21  ;;  %v357_v25 = vld [vmem:[%s1201_s2 + $0x38] sm:$0xff] (!%p206_p10)  ;;  %v436_v27 = vld [vmem:[%s1202_s3] sm:$0xff] (!%p206_p10)  ;;  %v437_v28 = vld [vmem:[%s1202_s3 + $0x8] sm:$0xff] (!%p206_p10) }
  0x14   : > { %v790_v26 = vpack.c.bf16 (!%p206_p10), %v357_v25, %v356_v24  ;;  %v793_v29 = vpack.c.bf16 (!%p206_p10), %v437_v28, %v436_v27  ;;  %v438_v30 = vld [vmem:[%s1202_s3 + $0x10] sm:$0xff] (!%p206_p10)  ;;  %v439_v31 = vld [vmem:[%s1202_s3 + $0x18] sm:$0xff] (!%p206_p10)  ;;  %v440_v33 = vld [vmem:[%s1202_s3 + $0x20] sm:$0xff] (!%p206_p10) }
  0x15   : > { %773 = vmatpush3.bf16.msra.mxu1 (!%p206_p10), %v772_v7  ;;  %v796_v32 = vpack.c.bf16 (!%p206_p10), %v439_v31, %v438_v30  ;;  %v441_v34 = vld [vmem:[%s1202_s3 + $0x28] sm:$0xff] (!%p206_p10)  ;;  %v442_v36 = vld [vmem:[%s1202_s3 + $0x30] sm:$0xff] (!%p206_p10)  ;;  %v443_v37 = vld [vmem:[%s1202_s3 + $0x38] sm:$0xff] (!%p206_p10) }
  0x16   : > { %s244_s21 = scalar_select %p243_p11, %s942_s18, 1  ;;  %774 = vmatprep.subr.bf16.mxu1 %v952_v3  ;;  %794 = vmatpush3.bf16.msra.mxu0 %v793_v29  ;;  %v799_v35 = vpack.c.bf16 %v441_v34, %v440_v33  ;;  %v802_v38 = vpack.c.bf16 %v443_v37, %v442_v36  ;;  %v444_v39 = vld [vmem:[%s1202_s3 + $0x40] sm:$0xff]  ;;  %v445_v40 = vld [vmem:[%s1202_s3 + $0x48] sm:$0xff]  ;;  %v446_v42 = vld [vmem:[%s1202_s3 + $0x50] sm:$0xff] }
  0x17   : > { %795 = vmatprep.subr.bf16.mxu0 %v952_v3  ;;  %v805_v41 = vpack.c.bf16 %v445_v40, %v444_v39  ;;  %v447_v43 = vld [vmem:[%s1202_s3 + $0x58] sm:$0xff]  ;;  %v435_v56 = vld [vmem:[#allocation2] sm:$0xff]  ;;  %s955_s18 = smov [#allocation3]  }
  0x18   : > { %s664_s30 = sshll.u32 %s244_s21, 3  ;;  %v808_v44 = vpack.c.bf16 %v447_v43, %v446_v42  ;;  %s876_s10 = sshll.u32 %s955_s18, 4  ;;  %s877_s10 = int_to_ptr.vmem [resolvable:$false] %s876_s10 }
  0x19   : > { %776 = vmatpush3.bf16.msra.mxu1 %v775_v10  ;;  %s246_s7 = scalar_lea.vmem %s1199_s0, %s664_s30  ;;  %s543_s30 = sshll.u32 %s242_s29, 4  ;;  %s1153_s30 = int_to_ptr.vmem [resolvable:$true] %s543_s30 }
  0x1a   : > { %777 = vmatprep.subr.bf16.mxu1 %v952_v3  ;;  %v267_v16 = vld [vmem:[%s246_s7] sm:$0xff]  ;;  %797 = vmatpush3.bf16.msra.mxu0 %v796_v32  ;;  %s1151_s7 = scalar_lea.hbm %s1203_s4, %s669_s26  ;;  %s872_s9 = scalar_lea.vmem %s1153_s30, 128 }
  0x1b   : > { %798 = vmatprep.subr.bf16.mxu0 %v952_v3  ;;  %p873_p12 = scmp.ne.s32.totalorder %s1153_s30, %s872_s9  ;;  %s878_s11 = scalar_lea.vmem %s877_s10, 256 }
  0x1c   : > { %p879_p1 = scmp.lt.s32.totalorder %s1153_s30, %s877_s10  ;;  %p880_p2 = scmp.lt.s32.totalorder %s878_s11, %s872_s9 }
  0x1d   : > { %779 = vmatpush3.bf16.msra.mxu1 %v778_v13  ;;  %p874_p13 = pnand %p873_p12, %p1021_p4 }
  0x1e   : > { %780 = vmatprep.subr.bf16.mxu1 %v952_v3  ;;  %800 = vmatpush3.bf16.msra.mxu0 %v799_v35  ;;  %p881_p3 = por %p880_p2, %p879_p1 }
  0x1f   : > { %801 = vmatprep.subr.bf16.mxu0 %v952_v3  ;;  %p875_p0 = pneg %p874_p13 }
  0x20   : > { %720 = vmatmul.mubr.msk.f32.vlgmr.msra.gmra.mrb[0].mxu1 %vm265_vm1, %v267_v16 }
  0x21   : > { %782 = vmatpush3.bf16.msra.mxu1 %v781_v17  ;;  %738 = vmatprep.mubr.msk.f32.mxu1 %vm953_vm0, %v954_v6  ;;  %p882_p5 = pnand %p881_p3, %p875_p0 }
  0x22   : > { %783 = vmatprep.subr.bf16.mxu1 %v952_v3  ;;  %803 = vmatpush3.bf16.msra.mxu0 %v802_v38 }
  0x23   : > { %804 = vmatprep.subr.bf16.mxu0 %v952_v3 }
  0x25   : > { %785 = vmatpush3.bf16.msra.mxu1 %v784_v20 }
  0x26   : > { %786 = vmatprep.subr.bf16.mxu1 %v952_v3  ;;  %806 = vmatpush3.bf16.msra.mxu0 %v805_v41 }
  0x27   : > { %807 = vmatprep.subr.bf16.mxu0 %v952_v3 }
  0x29   : > { %788 = vmatpush3.bf16.msra.mxu1 %v787_v23 }
  0x2a   : > { %789 = vmatprep.subr.bf16.mxu1 %v952_v3  ;;  %809 = vmatpush3.bf16.msra.mxu0 %v808_v44 }
  0x2d   : > { %791 = vmatpush3.bf16.msra.mxu1 %v790_v26 }
  0x30   : > { %739 = vmatmul.mubr.msk.f32.vlgmr.msra.gmra.mrb[2].mxu1 %vm265_vm1, %v267_v16 }
  0xf3   : > { %v346_v45 = vpop.f32.mrb[0].mxu1 }
  0xf4   : > { %v428_v46 = vsub.f32 0.0, %v346_v45  ;;  %v721_v47 = vpop.f32.mrb[1].mxu1 }
  0xf6   : > { %v429_v48 = vmul.f32 1.442695, %v428_v46 }
  0xf8   : > { %868 = vpow2.f32 %v429_v48 }
 0x102   : > { %v869_v49 = vpop.eup %868 }
 0x103   : > { %v431_v50 = vadd.f32 1.0, %v869_v49  ;;  %v424_v51 = vpop.f32.mrb[2].mxu1 }
 0x104   : > { %v740_v52 = vpop.f32.mrb[3].mxu1 }
 0x105   : > { %870 = vrcp.f32 %v431_v50 }
 0x10f   : > { %v871_v53 = vpop.eup %870 }
 0x110   : > { %v433_v54 = vmul.f32 %v871_v53, %v346_v45 }
 0x112   : > { %v434_v55 = vmul.f32 %v433_v54, %v424_v51 }
 0x114   : > { %766 = vmatmul.mubr.msk.f32.vlgmr.msra.gmra.mrb[0].mxu0 %vm448_vm2, %v434_v55 }
 0x1e7   : > { %v518_v57 = vpop.f32.mrb[0].mxu0 }
 0x1e8   : > { %v522_v58 = vadd.f32 %v518_v57, %v435_v56  ;;  %v767_v59 = vpop.f32.mrb[1].mxu0 }
 0x1ea   : > { %523 = vst.msk [vmem:[#allocation2] sm:$0xff] %vm265_vm1, %v522_v58 }
 0x1f1   : > { %v527_v60 = vld [vmem:[#allocation2] sm:$0xff] }
 0x1f2   : > { %528 = vst.msk [vmem:[%s242_s29] sm:$0xff] %vm265_vm1, %v527_v60 }
 0x1f3   : > { %885 = shalt.err (!%p882_p5)
}
 0x1f4   : > { %s886_s12 = scalar_lea.hbm %s1151_s7, 128  ;;  %s890_s21 = scalar_lea.hbm %s1203_s4, 256 }
 0x1f5   : > { %p887_p6 = scmp.ne.s32.totalorder %s1151_s7, %s886_s12  ;;  %p891_p10 = scmp.lt.u32.totalorder %s1151_s7, %s1203_s4 }
 0x1f6   : > { %p892_p11 = scmp.lt.u32.totalorder %s890_s21, %s886_s12  ;;  %p894_p13 = scmp.lt.u32.totalorder %s886_s12, %s1151_s7 }
 0x1f7   : > { %p888_p7 = pnand %p887_p6, %p1021_p4 }
 0x1f8   : > { %p893_p12 = por %p892_p11, %p891_p10 }
 0x1f9   : > { %p889_p9 = pneg %p888_p7 }
 0x1fa   : > { %p895_p0 = por %p894_p13, %p893_p12 }
 0x1fc   : > { %p896_p1 = pnand %p895_p0, %p889_p9 }
 0x1fe   : > { %899 = shalt.err (!%p896_p1)
}
 0x1ff   : > { %810 = dma.vmem_to_hbm [thread:$0]  (%p1021_p4), %s1153_s30, 128, %s1151_s7, %s530_s8  }
 0x200 PF: > { %p816_p2 = scmp.ge.s32.totalorder %s950_s20, 2  ;;  %s555_s26 = sand.u32 1, %s930_s15  }
 0x201   : > { %s556_s29 = scalar_lea.sflag [#allocation4], %s555_s26 }
 0x202   : > { %p813_p3 = pnand %p816_p2, %p1028_p8 }
 0x204   : > { %925 = dma.done.wait (!%p813_p3), %s556_s29, 128  }
 0x205   : > { %927 = vsyncadd (!%p813_p3), %s556_s29, 4294967168  ;;  %s17_s20 = sadd.s32 1, %s950_s20   ;;  %s1206_s15 = smov %s934_s16 }
 0x206   : > { %p14_p5 = scmp.ge.s32.totalorder %s17_s20, 4   ;;  %s1207_s16 = smov %s938_s17 }
 0x207   : > { %s1208_s17 = smov %s1034_s28  ;;  %s1209_s18 = smov %s946_s19 }
 0x208   : > { %s1210_s19 = smov %s1212_s23  ;;  %16 = sbr.rel (!%p14_p5) target bundleno = 4 (0x4), region = 88 }
 0x20f   :  { %561 = vsyncpa [#allocation4], 1 }
 0x210   :  { %563 = vsyncpa [#allocation4 + $0x1], 1 }

</bundles_post_ra>
